<compile_context>
chip_gen: v5e
topology: v5e:2x2
jax: 0.10.0
libtpu: 0.0.40
codegen_flags: <defaults>
</compile_context>

<pallas_src>
import jax
import jax.numpy as jnp
from jax.experimental import pallas as pl
from jax.experimental.pallas import tpu as pltpu

# ---------------- problem sizes (small, consistent with the module) ----------
N_B = 2         # batch
N_A = 8         # atoms
N_NBH = 8       # neighbors per atom
N_IN = 32       # input embedding dim
N_FILTERS = 32  # filter dim
N_OUT = 32      # output dim
N_BASIS = 16    # Gaussian-smearing basis size for f_ij
CUTOFF = 5.0    # cosine cutoff radius
LN2 = 0.6931471805599453


def _ssp(v):
    # shifted softplus: log(1 + exp(v)) - log(2), numerically stable form.
    return jnp.maximum(v, 0.0) + jnp.log(1.0 + jnp.exp(-jnp.abs(v))) - LN2


# ------------------------------- Pallas kernel --------------------------------
def _cfconv_kernel(x_ref, fij_ref, onehot_ref, seg_ref,
                   w_in2f_ref, wf1_ref, bf1_ref, wf2_ref, bf2_ref,
                   wout_ref, bout_ref, out_ref):
    f32 = jnp.float32

    # filter network: Dense(n_basis, n_filters, ssp) -> Dense(n_filters, n_filters)
    h = _ssp(jnp.dot(fij_ref[...], wf1_ref[...], preferred_element_type=f32)
             + bf1_ref[...])
    W = jnp.dot(h, wf2_ref[...], preferred_element_type=f32) + bf2_ref[...]

    # in2f: Dense(n_in, n_filters, bias=False)
    y = jnp.dot(x_ref[...], w_in2f_ref[...], preferred_element_type=f32)  # (B*A, F)

    # neighbor gather as one-hot @ y (MXU), then apply the filter.
    y_nbh = jnp.dot(onehot_ref[...], y, preferred_element_type=f32) * W   # (B*AN, F)

    # masked sum over the neighbor axis: segment matrix already carries
    # cosine-cutoff * pairwise-mask per row, so this single matmul does
    # mask + cutoff + aggregation.
    agg = jnp.dot(seg_ref[...], y_nbh, preferred_element_type=f32)        # (B*A, F)

    # f2out: Dense(n_filters, n_out, bias=True, activation=shifted_softplus)
    out = _ssp(jnp.dot(agg, wout_ref[...], preferred_element_type=f32)
               + bout_ref[...])
    out_ref[...] = out.astype(out_ref.dtype)


# ------------------------------ wrapper ---------------------------------------
@jax.jit
def cfconv_forward(x, r_ij, neighbors, pairwise_mask, f_ij, params):
    B, A, n_in = x.shape
    N = r_ij.shape[2]
    AN = A * N
    n_basis = f_ij.shape[-1]
    n_out = params["wout"].shape[1]

    # ---- plain-XLA glue: fold batch into rows, precompute cheap constants ----
    x2 = x.reshape(B * A, n_in).astype(jnp.float32)                 # (B*A, n_in)
    fij2 = f_ij.reshape(B * AN, n_basis).astype(jnp.float32)        # (B*AN, n_basis)

    # cosine cutoff * pairwise mask, one scalar per folded neighbor row.
    C = 0.5 * (jnp.cos(r_ij * (jnp.pi / CUTOFF)) + 1.0) * (r_ij < CUTOFF)
    cmask = (C * pairwise_mask).reshape(B * AN).astype(jnp.float32)  # (B*AN,)

    # one-hot gather matrix over the batch-folded atom axis: row p of batch b
    # selects atom (b*A + neighbors[b, p]).
    cols = (neighbors.reshape(B, AN).astype(jnp.int32)
            + (jnp.arange(B, dtype=jnp.int32) * A)[:, None])        # (B, AN)
    onehot = (cols.reshape(B * AN, 1)
              == jnp.arange(B * A, dtype=jnp.int32)[None, :]).astype(jnp.float32)

    # segment matrix for the neighbor-axis sum, with the cutoff*mask column
    # folded in: seg[row, col] = (col // N == row) * cmask[col].
    seg = ((jnp.arange(B * AN, dtype=jnp.int32)[None, :] // N
            == jnp.arange(B * A, dtype=jnp.int32)[:, None]).astype(jnp.float32)
           * cmask[None, :])                                         # (B*A, B*AN)

    vmem_specs = [pl.BlockSpec(memory_space=pltpu.MemorySpace.VMEM)
                  for _ in range(11)]

    out2 = pl.pallas_call(
        _cfconv_kernel,
        out_shape=jax.ShapeDtypeStruct((B * A, n_out), jnp.float32),
        in_specs=vmem_specs,
        out_specs=pl.BlockSpec(memory_space=pltpu.MemorySpace.VMEM),
    )(x2, fij2, onehot, seg,
      params["w_in2f"].astype(jnp.float32), params["wf1"].astype(jnp.float32),
      params["bf1"].astype(jnp.float32), params["wf2"].astype(jnp.float32),
      params["bf2"].astype(jnp.float32), params["wout"].astype(jnp.float32),
      params["bout"].astype(jnp.float32))

    return out2.reshape(B, A, n_out)


# --------------------------- pure-JAX reference --------------------------------
def cfconv_reference(x, r_ij, neighbors, pairwise_mask, f_ij, p):
    W = _ssp(f_ij @ p["wf1"] + p["bf1"]) @ p["wf2"] + p["bf2"]
    C = 0.5 * (jnp.cos(r_ij * (jnp.pi / CUTOFF)) + 1.0) * (r_ij < CUTOFF)
    W = W * C[..., None]
    y = x @ p["w_in2f"]
    y_nbh = jax.vmap(lambda yb, nb: yb[nb])(y, neighbors)      # (B, A, N, F)
    y_nbh = y_nbh * W * pairwise_mask[..., None]
    agg = jnp.sum(y_nbh, axis=2)                               # normalize_filter=False
    return _ssp(agg @ p["wout"] + p["bout"])


# ----------------------------------- main --------------------------------------
if __name__ == "__main__":
    key = jax.random.PRNGKey(0)
    ks = jax.random.split(key, 12)

    # deterministic synthetic parameters (stored as (in, out); Dense semantics)
    params = {
        "w_in2f": 0.1 * jax.random.normal(ks[0], (N_IN, N_FILTERS), jnp.float32),
        "wf1":    0.1 * jax.random.normal(ks[1], (N_BASIS, N_FILTERS), jnp.float32),
        "bf1":    0.1 * jax.random.normal(ks[2], (1, N_FILTERS), jnp.float32),
        "wf2":    0.1 * jax.random.normal(ks[3], (N_FILTERS, N_FILTERS), jnp.float32),
        "bf2":    0.1 * jax.random.normal(ks[4], (1, N_FILTERS), jnp.float32),
        "wout":   0.1 * jax.random.normal(ks[5], (N_FILTERS, N_OUT), jnp.float32),
        "bout":   0.1 * jax.random.normal(ks[6], (1, N_OUT), jnp.float32),
    }

    # inputs
    x = jax.random.normal(ks[7], (N_B, N_A, N_IN), jnp.float32)
    r_ij = jax.random.uniform(ks[8], (N_B, N_A, N_NBH), jnp.float32, 0.5, 6.0)
    neighbors = jax.random.randint(ks[9], (N_B, N_A, N_NBH), 0, N_A, jnp.int32)
    pairwise_mask = (jax.random.uniform(ks[10], (N_B, N_A, N_NBH)) > 0.2
                     ).astype(jnp.float32)

    # f_ij = Gaussian smearing of r_ij into N_BASIS basis functions
    centers = jnp.linspace(0.0, CUTOFF, N_BASIS)
    gamma = 10.0
    f_ij = jnp.exp(-gamma * (r_ij[..., None] - centers) ** 2).astype(jnp.float32)

    out = cfconv_forward(x, r_ij, neighbors, pairwise_mask, f_ij, params)
    out = jax.block_until_ready(out)

    ref = cfconv_reference(x, r_ij, neighbors, pairwise_mask, f_ij, params)
    assert out.shape == (N_B, N_A, N_OUT)
    assert jnp.allclose(out, ref, rtol=1e-4, atol=1e-4), "mismatch vs reference"

    print("KERNEL_OK")
</pallas_src>

<mosaic_0001>
module attributes {stable_mosaic.version = 11 : i64} {
  func.func @_cfconv_kernel(%arg0: memref<16x32xf32, #tpu.memory_space<vmem>>, %arg1: memref<128x16xf32, #tpu.memory_space<vmem>>, %arg2: memref<128x16xf32, #tpu.memory_space<vmem>>, %arg3: memref<16x128xf32, #tpu.memory_space<vmem>>, %arg4: memref<32x32xf32, #tpu.memory_space<vmem>>, %arg5: memref<16x32xf32, #tpu.memory_space<vmem>>, %arg6: memref<1x32xf32, #tpu.memory_space<vmem>>, %arg7: memref<32x32xf32, #tpu.memory_space<vmem>>, %arg8: memref<1x32xf32, #tpu.memory_space<vmem>>, %arg9: memref<32x32xf32, #tpu.memory_space<vmem>>, %arg10: memref<1x32xf32, #tpu.memory_space<vmem>>, %arg11: memref<16x32xf32, #tpu.memory_space<vmem>>) attributes {dimension_semantics = [], scalar_prefetch = 0 : i64, scratch_operands = 0 : i64, tpu.core_type = #tpu.core_type<tc>} {
    %c0 = arith.constant 0 : index
    %c0_0 = arith.constant 0 : index
    %0 = vector.load %arg1[%c0, %c0_0] : memref<128x16xf32, #tpu.memory_space<vmem>>, vector<128x16xf32>
    %c0_1 = arith.constant 0 : index
    %c0_2 = arith.constant 0 : index
    %1 = vector.load %arg5[%c0_1, %c0_2] : memref<16x32xf32, #tpu.memory_space<vmem>>, vector<16x32xf32>
    %cst = arith.constant dense<0.000000e+00> : vector<128x32xf32>
    %2 = tpu.matmul %0, %1, %cst {dimension_numbers = #tpu.dot_dimension_numbers<[1], [0], [0], [1], [0, 0, 1, 1], [], []>} : vector<128x16xf32>, vector<16x32xf32>, vector<128x32xf32> -> vector<128x32xf32>
    %c0_3 = arith.constant 0 : index
    %c0_4 = arith.constant 0 : index
    %3 = vector.load %arg6[%c0_3, %c0_4] : memref<1x32xf32, #tpu.memory_space<vmem>>, vector<1x32xf32>
    %4 = vector.broadcast %3 : vector<1x32xf32> to vector<128x32xf32>
    %5 = arith.addf %2, %4 : vector<128x32xf32>
    %cst_5 = arith.constant 0.000000e+00 : f32
    %6 = vector.broadcast %cst_5 : f32 to vector<128x32xf32>
    %7 = arith.maximumf %5, %6 : vector<128x32xf32>
    %8 = math.absf %5 : vector<128x32xf32>
    %cst_6 = arith.constant 0.000000e+00 : f32
    %9 = vector.broadcast %cst_6 : f32 to vector<128x32xf32>
    %10 = arith.subf %9, %8 : vector<128x32xf32>
    %11 = math.exp %10 : vector<128x32xf32>
    %cst_7 = arith.constant 1.000000e+00 : f32
    %12 = vector.broadcast %cst_7 : f32 to vector<128x32xf32>
    %13 = arith.addf %12, %11 : vector<128x32xf32>
    %14 = math.log %13 : vector<128x32xf32>
    %15 = arith.addf %7, %14 : vector<128x32xf32>
    %cst_8 = arith.constant 0.693147182 : f32
    %16 = vector.broadcast %cst_8 : f32 to vector<128x32xf32>
    %17 = arith.subf %15, %16 : vector<128x32xf32>
    %c0_9 = arith.constant 0 : index
    %c0_10 = arith.constant 0 : index
    %18 = vector.load %arg7[%c0_9, %c0_10] : memref<32x32xf32, #tpu.memory_space<vmem>>, vector<32x32xf32>
    %cst_11 = arith.constant dense<0.000000e+00> : vector<128x32xf32>
    %19 = tpu.matmul %17, %18, %cst_11 {dimension_numbers = #tpu.dot_dimension_numbers<[1], [0], [0], [1], [0, 0, 1, 1], [], []>} : vector<128x32xf32>, vector<32x32xf32>, vector<128x32xf32> -> vector<128x32xf32>
    %c0_12 = arith.constant 0 : index
    %c0_13 = arith.constant 0 : index
    %20 = vector.load %arg8[%c0_12, %c0_13] : memref<1x32xf32, #tpu.memory_space<vmem>>, vector<1x32xf32>
    %21 = vector.broadcast %20 : vector<1x32xf32> to vector<128x32xf32>
    %22 = arith.addf %19, %21 : vector<128x32xf32>
    %c0_14 = arith.constant 0 : index
    %c0_15 = arith.constant 0 : index
    %23 = vector.load %arg0[%c0_14, %c0_15] : memref<16x32xf32, #tpu.memory_space<vmem>>, vector<16x32xf32>
    %c0_16 = arith.constant 0 : index
    %c0_17 = arith.constant 0 : index
    %24 = vector.load %arg4[%c0_16, %c0_17] : memref<32x32xf32, #tpu.memory_space<vmem>>, vector<32x32xf32>
    %cst_18 = arith.constant dense<0.000000e+00> : vector<16x32xf32>
    %25 = tpu.matmul %23, %24, %cst_18 {dimension_numbers = #tpu.dot_dimension_numbers<[1], [0], [0], [1], [0, 0, 1, 1], [], []>} : vector<16x32xf32>, vector<32x32xf32>, vector<16x32xf32> -> vector<16x32xf32>
    %c0_19 = arith.constant 0 : index
    %c0_20 = arith.constant 0 : index
    %26 = vector.load %arg2[%c0_19, %c0_20] : memref<128x16xf32, #tpu.memory_space<vmem>>, vector<128x16xf32>
    %cst_21 = arith.constant dense<0.000000e+00> : vector<128x32xf32>
    %27 = tpu.matmul %26, %25, %cst_21 {dimension_numbers = #tpu.dot_dimension_numbers<[1], [0], [0], [1], [0, 0, 1, 1], [], []>} : vector<128x16xf32>, vector<16x32xf32>, vector<128x32xf32> -> vector<128x32xf32>
    %28 = arith.mulf %27, %22 : vector<128x32xf32>
    %c0_22 = arith.constant 0 : index
    %c0_23 = arith.constant 0 : index
    %29 = vector.load %arg3[%c0_22, %c0_23] : memref<16x128xf32, #tpu.memory_space<vmem>>, vector<16x128xf32>
    %cst_24 = arith.constant dense<0.000000e+00> : vector<16x32xf32>
    %30 = tpu.matmul %29, %28, %cst_24 {dimension_numbers = #tpu.dot_dimension_numbers<[1], [0], [0], [1], [0, 0, 1, 1], [], []>} : vector<16x128xf32>, vector<128x32xf32>, vector<16x32xf32> -> vector<16x32xf32>
    %c0_25 = arith.constant 0 : index
    %c0_26 = arith.constant 0 : index
    %31 = vector.load %arg9[%c0_25, %c0_26] : memref<32x32xf32, #tpu.memory_space<vmem>>, vector<32x32xf32>
    %cst_27 = arith.constant dense<0.000000e+00> : vector<16x32xf32>
    %32 = tpu.matmul %30, %31, %cst_27 {dimension_numbers = #tpu.dot_dimension_numbers<[1], [0], [0], [1], [0, 0, 1, 1], [], []>} : vector<16x32xf32>, vector<32x32xf32>, vector<16x32xf32> -> vector<16x32xf32>
    %c0_28 = arith.constant 0 : index
    %c0_29 = arith.constant 0 : index
    %33 = vector.load %arg10[%c0_28, %c0_29] : memref<1x32xf32, #tpu.memory_space<vmem>>, vector<1x32xf32>
    %34 = vector.broadcast %33 : vector<1x32xf32> to vector<16x32xf32>
    %35 = arith.addf %32, %34 : vector<16x32xf32>
    %cst_30 = arith.constant 0.000000e+00 : f32
    %36 = vector.broadcast %cst_30 : f32 to vector<16x32xf32>
    %37 = arith.maximumf %35, %36 : vector<16x32xf32>
    %38 = math.absf %35 : vector<16x32xf32>
    %cst_31 = arith.constant 0.000000e+00 : f32
    %39 = vector.broadcast %cst_31 : f32 to vector<16x32xf32>
    %40 = arith.subf %39, %38 : vector<16x32xf32>
    %41 = math.exp %40 : vector<16x32xf32>
    %cst_32 = arith.constant 1.000000e+00 : f32
    %42 = vector.broadcast %cst_32 : f32 to vector<16x32xf32>
    %43 = arith.addf %42, %41 : vector<16x32xf32>
    %44 = math.log %43 : vector<16x32xf32>
    %45 = arith.addf %37, %44 : vector<16x32xf32>
    %cst_33 = arith.constant 0.693147182 : f32
    %46 = vector.broadcast %cst_33 : f32 to vector<16x32xf32>
    %47 = arith.subf %45, %46 : vector<16x32xf32>
    %c0_34 = arith.constant 0 : index
    %c0_35 = arith.constant 0 : index
    %48 = vector.load %arg11[%c0_34, %c0_35] : memref<16x32xf32, #tpu.memory_space<vmem>>, vector<16x32xf32>
    tpu.vector_store %arg11[%c0_34, %c0_35], %47 {strides = array<i32>} : memref<16x32xf32, #tpu.memory_space<vmem>>, vector<16x32xf32>,
    return
  }
}

</mosaic_0001>

<bundles_post_ra>
// kernel: mul.19
= control target key start
LH: loop header
LB: loop body
LE: loop exit
PB: predicated region body
PF: predicated region fallthrough
CT: control target
= control target key end

     0   :  { %s131_s10 = smov 120   ;;  %s132_s11 = smov 104   ;;  %vm3_vm0 = vcmask 64512   ;;  %vm9_vm1 = vcmask 1048512   ;;  %vm15_vm2 = vcmask 982912   ;;  %vm21_vm3 = vcmask 917312   ;;  %s207_s0 = inlined_call_operand.vmem [shape: f32[2,8,8], index: 0, kind: input, shape index: {}]   ;;  %s208_s1 = inlined_call_operand.vmem [shape: f32[128], index: 1, kind: output, shape index: {}]  }
   0x1   :  { %v101_v0 = vld [vmem:[%s207_s0 + $0xf] sm:$0x1]   ;;  %v103_v1 = vld [vmem:[%s207_s0 + $0xd] sm:$0x1]   ;;  %v105_v2 = vld [vmem:[%s207_s0 + $0xb] sm:$0x1]  }
   0x2   :  { %7 = vrot.lane.b32.xlu0 %v101_v0, %s131_s10  ;;  %19 = vrot.lane.b32.xlu1 %v103_v1, %s132_s11  ;;  %s133_s14 = smov 88   ;;  %v102_v3 = vld [vmem:[%s207_s0 + $0xe] sm:$0x1]   ;;  %v104_v4 = vld [vmem:[%s207_s0 + $0xc] sm:$0x1]   ;;  %s134_s19 = smov 112  }
   0x3   :  { %31 = vrot.lane.b32.xlu2 %v105_v2, %s133_s14  ;;  %s135_s20 = smov 96   ;;  %v106_v5 = vld [vmem:[%s207_s0 + $0xa] sm:$0x1]   ;;  %s136_s23 = smov 80   ;;  %v107_v6 = vld [vmem:[%s207_s0 + $0x9] sm:$0x1]  }
   0x4   :  { %v108_v7 = vld [vmem:[%s207_s0 + $0x8] sm:$0x1]   ;;  %s137_s28 = smov 72   ;;  %s138_s29 = smov 64   ;;  %v109_v8 = vld [vmem:[%s207_s0 + $0x7] sm:$0x1]  }
   0x5   :  { %s139_s3 = smov 56   ;;  %v110_v9 = vld [vmem:[%s207_s0 + $0x6] sm:$0x1]   ;;  %v111_v10 = vld [vmem:[%s207_s0 + $0x5] sm:$0x1]   ;;  %s140_s8 = smov 48  }
   0x6   :  { %s141_s9 = smov 40   ;;  %v112_v11 = vld [vmem:[%s207_s0 + $0x4] sm:$0x1]   ;;  %s142_s12 = smov 32   ;;  %v113_v12 = vld [vmem:[%s207_s0 + $0x3] sm:$0x1]  }
   0x7   :  { %v114_v13 = vld [vmem:[%s207_s0 + $0x2] sm:$0x1]   ;;  %s143_s17 = smov 24   ;;  %s144_s18 = smov 16   ;;  %v115_v14 = vld [vmem:[%s207_s0 + $0x1] sm:$0x1]  }
   0x8   :  { %s145_s21 = smov 8   ;;  %v2_v15 = vld [vmem:[%s207_s0] sm:$0x1]   ;;  %vm27_vm4 = vcmask 851712   ;;  %vm33_vm5 = vcmask 786112   ;;  %vm39_vm6 = vcmask 720512  }
   0x9   :  { %4 = vst.msk [vmem:[#allocation0] sm:$0x1] %vm3_vm0, %v2_v15   ;;  %vm45_vm7 = vcmask 654912   ;;  %vm51_vm8 = vcmask 589312   ;;  %vm57_vm9 = vcmask 523712   ;;  %vm63_vm10 = vcmask 458112  }
   0xa   :  { %13 = vrot.lane.b32.xlu0 %v102_v3, %s134_s19  ;;  %25 = vrot.lane.b32.xlu1 %v104_v4, %s135_s20  ;;  %vm69_vm11 = vcmask 392512   ;;  %vm75_vm12 = vcmask 326912   ;;  %vm81_vm13 = vcmask 261312   ;;  %vm87_vm14 = vcmask 195712  }
   0xb   :  { %37 = vrot.lane.b32.xlu2 %v106_v5, %s136_s23  ;;  %vm93_vm15 = vcmask 130112  }
  0x12   :  { %43 = vrot.lane.b32.xlu0 %v107_v6, %s137_s28  ;;  %49 = vrot.lane.b32.xlu1 %v108_v7, %s138_s29 }
  0x13   :  { %55 = vrot.lane.b32.xlu2 %v109_v8, %s139_s3 }
  0x1a   :  { %61 = vrot.lane.b32.xlu0 %v110_v9, %s140_s8  ;;  %67 = vrot.lane.b32.xlu1 %v111_v10, %s141_s9 }
  0x1b   :  { %73 = vrot.lane.b32.xlu2 %v112_v11, %s142_s12 }
  0x22   :  { %79 = vrot.lane.b32.xlu0 %v113_v12, %s143_s17  ;;  %85 = vrot.lane.b32.xlu1 %v114_v13, %s144_s18 }
  0x23   :  { %91 = vrot.lane.b32.xlu2 %v115_v14, %s145_s21 }
  0x5d   :  { %v32_v16 = vpop.permute.xlu2 %31  }
  0x65   :  { %v38_v17 = vpop.permute.xlu2 %37  }
  0x6d   :  { %v56_v18 = vpop.permute.xlu2 %55  }
  0x74   :  { %v8_v19 = vpop.permute.xlu0 %7   ;;  %v20_v20 = vpop.permute.xlu1 %19  }
  0x75   :  { %10 = vst.msk [vmem:[#allocation0] sm:$0x1] %vm9_vm1, %v8_v19   ;;  %v74_v21 = vpop.permute.xlu2 %73  }
  0x7c   :  { %v14_v22 = vpop.permute.xlu0 %13   ;;  %v26_v23 = vpop.permute.xlu1 %25  }
  0x7d   :  { %16 = vst.msk [vmem:[#allocation0] sm:$0x1] %vm15_vm2, %v14_v22   ;;  %v92_v24 = vpop.permute.xlu2 %91  }
  0x7e   :  { %22 = vst.msk [vmem:[#allocation0] sm:$0x1] %vm21_vm3, %v20_v20  }
  0x7f   :  { %28 = vst.msk [vmem:[#allocation0] sm:$0x1] %vm27_vm4, %v26_v23  }
  0x80   :  { %34 = vst.msk [vmem:[#allocation0] sm:$0x1] %vm33_vm5, %v32_v16  }
  0x81   :  { %40 = vst.msk [vmem:[#allocation0] sm:$0x1] %vm39_vm6, %v38_v17  }
  0x84   :  { %v44_v25 = vpop.permute.xlu0 %43   ;;  %v50_v26 = vpop.permute.xlu1 %49  }
  0x85   :  { %46 = vst.msk [vmem:[#allocation0] sm:$0x1] %vm45_vm7, %v44_v25  }
  0x86   :  { %52 = vst.msk [vmem:[#allocation0] sm:$0x1] %vm51_vm8, %v50_v26  }
  0x87   :  { %58 = vst.msk [vmem:[#allocation0] sm:$0x1] %vm57_vm9, %v56_v18  }
  0x8c   :  { %v62_v27 = vpop.permute.xlu0 %61   ;;  %v68_v28 = vpop.permute.xlu1 %67  }
  0x8d   :  { %64 = vst.msk [vmem:[#allocation0] sm:$0x1] %vm63_vm10, %v62_v27  }
  0x8e   :  { %70 = vst.msk [vmem:[#allocation0] sm:$0x1] %vm69_vm11, %v68_v28  }
  0x8f   :  { %76 = vst.msk [vmem:[#allocation0] sm:$0x1] %vm75_vm12, %v74_v21  }
  0x94   :  { %v80_v29 = vpop.permute.xlu0 %79   ;;  %v86_v30 = vpop.permute.xlu1 %85  }
  0x95   :  { %82 = vst.msk [vmem:[#allocation0] sm:$0x1] %vm81_vm13, %v80_v29  }
  0x96   :  { %88 = vst.msk [vmem:[#allocation0] sm:$0x1] %vm87_vm14, %v86_v30  }
  0x97   :  { %94 = vst.msk [vmem:[#allocation0] sm:$0x1] %vm93_vm15, %v92_v24  }
  0x9e   :  { %v97_v31 = vld [vmem:[#allocation0] sm:$0x1] }
  0x9f   :  { %100 = vst [vmem:[%s208_s1] sm:$0x1] %v97_v31 }

// kernel: cfconv_forward.1
= control target key start
LH: loop header
LB: loop body
LE: loop exit
PB: predicated region body
PF: predicated region fallthrough
CT: control target
= control target key end

     0   :  { %16 = vsyncpa [#allocation3], 0  ;;  %s1343_s0 = inlined_call_operand.hbm [shape: f32[16,32], index: 0, kind: input, shape index: {}]   ;;  %s1344_s1 = inlined_call_operand.vmem [shape: f32[128,16], index: 1, kind: input, shape index: {}]   ;;  %s1345_s2 = inlined_call_operand.vmem [shape: f32[128,16], index: 2, kind: input, shape index: {}]   ;;  %s1346_s3 = inlined_call_operand.vmem [shape: f32[16,128], index: 3, kind: input, shape index: {}]   ;;  %s1347_s4 = inlined_call_operand.vmem [shape: f32[32,32], index: 4, kind: input, shape index: {}]   ;;  %s1348_s5 = inlined_call_operand.hbm [shape: f32[16,32], index: 5, kind: input, shape index: {}]   ;;  %s1349_s6 = inlined_call_operand.vmem [shape: f32[1,32], index: 6, kind: input, shape index: {}]   ;;  %s1350_s7 = inlined_call_operand.vmem [shape: f32[32,32], index: 7, kind: input, shape index: {}]   ;;  %s1351_s8 = inlined_call_operand.vmem [shape: f32[1,32], index: 8, kind: input, shape index: {}]   ;;  %s1352_s9 = inlined_call_operand.vmem [shape: f32[32,32], index: 9, kind: input, shape index: {}]   ;;  %s1353_s10 = inlined_call_operand.vmem [shape: f32[1,32], index: 10, kind: input, shape index: {}]   ;;  %s1354_s11 = inlined_call_operand.hbm [shape: f32[16,32], index: 11, kind: output, shape index: {}]  }
   0x1   :  { %17 = vsyncpa [#allocation6], 0 }
   0x2   :  { %18 = vsyncpa [#allocation4], 0  ;;  %s23_s19 = sshll.u32 %s1343_s0, 4  ;;  %s1007_s20 = smov [#allocation2]   ;;  %s24_s19 = int_to_ptr.hbm [resolvable:$true] %s23_s19 }
   0x3   :  { %s25_s21 = sshll.u32 %s1007_s20, 4  ;;  %s44_s24 = sshll.u32 %s1348_s5, 4  ;;  %s26_s21 = int_to_ptr.vmem [resolvable:$true] %s25_s21  ;;  %s45_s24 = int_to_ptr.hbm [resolvable:$true] %s44_s24 }
   0x4   :  { %s1008_s25 = smov 128   ;;  %s1009_s26 = smov 8  }
   0x5   :  { %31 = dma.hbm_to_vmem [thread:$0]  %s24_s19, 256, %s26_s21, [#allocation3], %s1008_s25, %s1008_s25, %s1009_s26  }
   0x6   :  { %s1010_s27 = smov [#allocation5]  }
   0x7   :  { %s46_s28 = sshll.u32 %s1010_s27, 4  ;;  %s47_s28 = int_to_ptr.vmem [resolvable:$true] %s46_s28 }
   0x8   :  { %52 = dma.hbm_to_vmem [thread:$0]  %s45_s24, 256, %s47_s28, [#allocation6], %s1008_s25, %s1008_s25, %s1009_s26  }
   0x9   :  { %1001 = dma.done.wait [#allocation3], 256  }
   0xa   :  { %1002 = vsyncadd [#allocation3], 4294967040 }
   0xb   :  { %1003 = dma.done.wait [#allocation6], 256  }
   0xc   :  { %1004 = vsyncadd [#allocation6], 4294967040  ;;  %v88_v0 = vld [vmem:[#allocation5 + $0x8] sm:$0xff]  ;;  %v87_v1 = vld [vmem:[#allocation5] sm:$0xff]  ;;  %vm93_vm0 = vcmask 130048   ;;  %vm375_vm1 = vcmask 261120  }
   0xd   :  { %156 = vmatpush.msra.mxu0 %v88_v0  ;;  %v71_v2 = vld [vmem:[%s1344_s1] sm:$0xff]  ;;  %843 = vmatpush.msra.mxu2 %v88_v0  ;;  %v72_v3 = vld [vmem:[%s1344_s1 + $0x8] sm:$0xff]  ;;  %v73_v4 = vld [vmem:[%s1344_s1 + $0x10] sm:$0xff]  ;;  %s759_s17 = sshll.u32 %s1354_s11, 4  ;;  %s760_s17 = int_to_ptr.hbm [resolvable:$true] %s759_s17 }
   0xe   :  { %v74_v5 = vld [vmem:[%s1344_s1 + $0x18] sm:$0xff]  ;;  %v75_v6 = vld [vmem:[%s1344_s1 + $0x20] sm:$0xff]  ;;  %v76_v7 = vld [vmem:[%s1344_s1 + $0x28] sm:$0xff] }
   0xf   :  { %157 = vmatpush.msra.mxu0 %v87_v1  ;;  %844 = vmatpush.msra.mxu2 %v87_v1  ;;  %v77_v8 = vld [vmem:[%s1344_s1 + $0x30] sm:$0xff]  ;;  %v78_v9 = vld [vmem:[%s1344_s1 + $0x38] sm:$0xff]  ;;  %v79_v11 = vld [vmem:[%s1344_s1 + $0x40] sm:$0xff] }
  0x10   :  { %773 = vmatmul.msk.f32.vlgmr.msra.gmra.mxu0 %vm93_vm0, %v71_v2  ;;  %v86_v10 = vld [vmem:[%s1344_s1 + $0x78] sm:$0xff]  ;;  %v80_v12 = vld [vmem:[%s1344_s1 + $0x48] sm:$0xff]  ;;  %v81_v13 = vld [vmem:[%s1344_s1 + $0x50] sm:$0xff] }
  0x11   :  { %788 = vmatmul.msk.f32.vlgmr.msra.gmra.mxu2 %vm93_vm0, %v86_v10  ;;  %v82_v14 = vld [vmem:[%s1344_s1 + $0x58] sm:$0xff]  ;;  %v83_v15 = vld [vmem:[%s1344_s1 + $0x60] sm:$0xff]  ;;  %v84_v16 = vld [vmem:[%s1344_s1 + $0x68] sm:$0xff] }
  0x12   :  { %v85_v17 = vld [vmem:[%s1344_s1 + $0x70] sm:$0xff]  ;;  %v370_v18 = vld [vmem:[%s1350_s7 + $0x18] sm:$0xff]  ;;  %v368_v20 = vld [vmem:[%s1350_s7 + $0x8] sm:$0xff] }
  0x13   :  { %436 = vmatpush.msra.mxu1 %v370_v18  ;;  %845 = vmatpush.msrb.mxu2 %v370_v18  ;;  %v369_v19 = vld [vmem:[%s1350_s7 + $0x10] sm:$0xff]  ;;  %v1160_v21 = vld [vmem:[%s1349_s6] ss:$0 sm:$0xff] }
  0x14   :  { %v367_v22 = vld [vmem:[%s1350_s7] sm:$0xff] }
  0x15   :  { %437 = vmatpush.msra.mxu1 %v369_v19  ;;  %846 = vmatpush.msrb.mxu2 %v369_v19 }
  0x17   :  { %438 = vmatpush.msra.mxu1 %v368_v20  ;;  %847 = vmatpush.msrb.mxu2 %v368_v20 }
  0x18   :  { %774 = vmatmul.msk.f32.gmra.mxu0 %vm93_vm0, %v72_v3 }
  0x19   :  { %439 = vmatpush.msra.mxu1 %v367_v22  ;;  %848 = vmatpush.msrb.mxu2 %v367_v22 }
  0x20   :  { %775 = vmatmul.msk.f32.gmra.mxu0 %vm93_vm0, %v73_v4 }
  0x28   :  { %776 = vmatmul.msk.f32.gmra.mxu0 %vm93_vm0, %v74_v5 }
  0x30   :  { %777 = vmatmul.msk.f32.gmra.mxu0 %vm93_vm0, %v75_v6 }
  0x38   :  { %778 = vmatmul.msk.f32.gmra.mxu0 %vm93_vm0, %v76_v7 }
  0x40   :  { %779 = vmatmul.msk.f32.gmra.mxu0 %vm93_vm0, %v77_v8 }
  0x48   :  { %780 = vmatmul.msk.f32.gmra.mxu0 %vm93_vm0, %v78_v9 }
  0x50   :  { %781 = vmatmul.msk.f32.gmra.mxu0 %vm93_vm0, %v79_v11 }
  0x58   :  { %782 = vmatmul.msk.f32.gmra.mxu0 %vm93_vm0, %v80_v12 }
  0x60   :  { %783 = vmatmul.msk.f32.gmra.mxu0 %vm93_vm0, %v81_v13 }
  0x68   :  { %784 = vmatmul.msk.f32.gmra.mxu0 %vm93_vm0, %v82_v14 }
  0x70   :  { %785 = vmatmul.msk.f32.gmra.mxu0 %vm93_vm0, %v83_v15 }
  0x78   :  { %786 = vmatmul.msk.f32.gmra.mxu0 %vm93_vm0, %v84_v16 }
  0x80   :  { %787 = vmatmul.msk.f32.gmra.mxu0 %vm93_vm0, %v85_v17 }
  0x8d   :  { %v159_v23 = vpop.f32.mrf.mxu0 }
  0x8e   :  { %v160_v24 = vadd.f32 %v1160_v21, %v159_v23 }
  0x90   :  { %v223_v25 = vand.u32 2147483647, %v160_v24  ;;  %v207_v44 = vmax.f32 %v160_v24, 0.0 }
  0x92   :  { %v239_v26 = vsub.f32 0.0, %v223_v25 }
  0x94   :  { %v255_v27 = vmul.f32 1.442695, %v239_v26 }
  0x95   :  { %v162_v28 = vpop.f32.mrf.mxu0 }
  0x96   :  { %857 = vpow2.f32 %v255_v27  ;;  %v163_v29 = vadd.f32 %v1160_v21, %v162_v28 }
  0x98   :  { %v224_v30 = vand.u32 2147483647, %v163_v29  ;;  %v208_v56 = vmax.f32 %v163_v29, 0.0 }
  0x9a   :  { %v240_v31 = vsub.f32 0.0, %v224_v30 }
  0x9c   :  { %v858_v32 = vpop.eup %857  ;;  %v257_v33 = vmul.f32 1.442695, %v240_v31 }
  0x9d   :  { %v287_v34 = vadd.f32 1.0, %v858_v32  ;;  %v165_v35 = vpop.f32.mrf.mxu0 }
  0x9e   :  { %859 = vpow2.f32 %v257_v33  ;;  %v166_v36 = vadd.f32 %v1160_v21, %v165_v35 }
  0x9f   :  { %861 = vlog2.f32 %v287_v34 }
  0xa0   :  { %v225_v37 = vand.u32 2147483647, %v166_v36  ;;  %v209_v4 = vmax.f32 %v166_v36, 0.0 }
  0xa2   :  { %v241_v38 = vsub.f32 0.0, %v225_v37 }
  0xa4   :  { %v860_v39 = vpop.eup %859  ;;  %v259_v40 = vmul.f32 1.442695, %v241_v38 }
  0xa5   :  { %v862_v41 = vpop.eup %861  ;;  %v288_v42 = vadd.f32 1.0, %v860_v39  ;;  %v168_v43 = vpop.f32.mrf.mxu0 }
  0xa6   :  { %863 = vpow2.f32 %v259_v40  ;;  %v169_v45 = vadd.f32 %v1160_v21, %v168_v43  ;;  %v304_v46 = vmul.f32 0.6931472, %v862_v41 }
  0xa7   :  { %865 = vlog2.f32 %v288_v42 }
  0xa8   :  { %v226_v47 = vand.u32 2147483647, %v169_v45  ;;  %v335_v48 = vadd.f32 %v304_v46, %v207_v44  ;;  %v210_v16 = vmax.f32 %v169_v45, 0.0 }
  0xaa   :  { %v242_v49 = vsub.f32 0.0, %v226_v47  ;;  %v789_v50 = vadd.f32 -0.6931472, %v335_v48 }
  0xac   :  { %v864_v51 = vpop.eup %863  ;;  %v261_v52 = vmul.f32 1.442695, %v242_v49  ;;  %805 = vmatmul.msk.f32.vlgmr.msra.gmra.mxu1 %vm375_vm1, %v789_v50 }
  0xad   :  { %v866_v53 = vpop.eup %865  ;;  %v289_v54 = vadd.f32 1.0, %v864_v51  ;;  %v171_v55 = vpop.f32.mrf.mxu0 }
  0xae   :  { %867 = vpow2.f32 %v261_v52  ;;  %v172_v57 = vadd.f32 %v1160_v21, %v171_v55  ;;  %v306_v58 = vmul.f32 0.6931472, %v866_v53 }
  0xaf   :  { %869 = vlog2.f32 %v289_v54 }
  0xb0   :  { %v227_v59 = vand.u32 2147483647, %v172_v57  ;;  %v336_v60 = vadd.f32 %v306_v58, %v208_v56  ;;  %v211_v29 = vmax.f32 %v172_v57, 0.0 }
  0xb2   :  { %v243_v61 = vsub.f32 0.0, %v227_v59  ;;  %v790_v62 = vadd.f32 -0.6931472, %v336_v60 }
  0xb4   :  { %v868_v63 = vpop.eup %867  ;;  %v263_v0 = vmul.f32 1.442695, %v243_v61  ;;  %806 = vmatmul.msk.f32.gmra.mxu1 %vm375_vm1, %v790_v62 }
  0xb5   :  { %v870_v1 = vpop.eup %869  ;;  %v290_v2 = vadd.f32 1.0, %v868_v63  ;;  %v174_v3 = vpop.f32.mrf.mxu0 }
  0xb6   :  { %871 = vpow2.f32 %v263_v0  ;;  %v175_v5 = vadd.f32 %v1160_v21, %v174_v3  ;;  %v308_v6 = vmul.f32 0.6931472, %v870_v1 }
  0xb7   :  { %873 = vlog2.f32 %v290_v2 }
  0xb8   :  { %v228_v7 = vand.u32 2147483647, %v175_v5  ;;  %v337_v8 = vadd.f32 %v308_v6, %v209_v4  ;;  %v212_v41 = vmax.f32 %v175_v5, 0.0 }
  0xba   :  { %v244_v9 = vsub.f32 0.0, %v228_v7  ;;  %v791_v10 = vadd.f32 -0.6931472, %v337_v8 }
  0xbc   :  { %v872_v11 = vpop.eup %871  ;;  %v265_v12 = vmul.f32 1.442695, %v244_v9  ;;  %807 = vmatmul.msk.f32.gmra.mxu1 %vm375_vm1, %v791_v10 }
  0xbd   :  { %v874_v13 = vpop.eup %873  ;;  %v291_v14 = vadd.f32 1.0, %v872_v11  ;;  %v177_v15 = vpop.f32.mrf.mxu0 }
  0xbe   :  { %875 = vpow2.f32 %v265_v12  ;;  %v178_v17 = vadd.f32 %v1160_v21, %v177_v15  ;;  %v310_v18 = vmul.f32 0.6931472, %v874_v13 }
  0xbf   :  { %877 = vlog2.f32 %v291_v14 }
  0xc0   :  { %v229_v19 = vand.u32 2147483647, %v178_v17  ;;  %v338_v20 = vadd.f32 %v310_v18, %v210_v16  ;;  %v213_v53 = vmax.f32 %v178_v17, 0.0 }
  0xc2   :  { %v245_v22 = vsub.f32 0.0, %v229_v19  ;;  %v792_v23 = vadd.f32 -0.6931472, %v338_v20 }
  0xc4   :  { %v876_v24 = vpop.eup %875  ;;  %v267_v25 = vmul.f32 1.442695, %v245_v22  ;;  %808 = vmatmul.msk.f32.gmra.mxu1 %vm375_vm1, %v792_v23 }
  0xc5   :  { %v878_v26 = vpop.eup %877  ;;  %v292_v27 = vadd.f32 1.0, %v876_v24  ;;  %v180_v28 = vpop.f32.mrf.mxu0 }
  0xc6   :  { %879 = vpow2.f32 %v267_v25  ;;  %v181_v30 = vadd.f32 %v1160_v21, %v180_v28  ;;  %v312_v31 = vmul.f32 0.6931472, %v878_v26 }
  0xc7   :  { %881 = vlog2.f32 %v292_v27 }
  0xc8   :  { %v230_v32 = vand.u32 2147483647, %v181_v30  ;;  %v339_v33 = vadd.f32 %v312_v31, %v211_v29  ;;  %v214_v1 = vmax.f32 %v181_v30, 0.0  ;;  %v204_v31 = vpop.f32.mrf.mxu2 }
  0xca   :  { %v246_v34 = vsub.f32 0.0, %v230_v32  ;;  %v793_v35 = vadd.f32 -0.6931472, %v339_v33 }
  0xcc   :  { %v880_v36 = vpop.eup %879  ;;  %v269_v37 = vmul.f32 1.442695, %v246_v34  ;;  %809 = vmatmul.msk.f32.gmra.mxu1 %vm375_vm1, %v793_v35 }
  0xcd   :  { %v882_v38 = vpop.eup %881  ;;  %v293_v39 = vadd.f32 1.0, %v880_v36  ;;  %v183_v40 = vpop.f32.mrf.mxu0  ;;  %v1188_v36 = vadd.f32 %v1160_v21, %v204_v31 }
  0xce   :  { %883 = vpow2.f32 %v269_v37  ;;  %v184_v42 = vadd.f32 %v1160_v21, %v183_v40  ;;  %v314_v43 = vmul.f32 0.6931472, %v882_v38 }
  0xcf   :  { %885 = vlog2.f32 %v293_v39 }
  0xd0   :  { %v231_v44 = vand.u32 2147483647, %v184_v42  ;;  %v340_v45 = vadd.f32 %v314_v43, %v212_v41  ;;  %v215_v13 = vmax.f32 %v184_v42, 0.0  ;;  %v238_v43 = vand.u32 2147483647, %v1188_v36 }
  0xd2   :  { %v247_v46 = vsub.f32 0.0, %v231_v44  ;;  %v794_v47 = vadd.f32 -0.6931472, %v340_v45 }
  0xd4   :  { %v884_v48 = vpop.eup %883  ;;  %v271_v49 = vmul.f32 1.442695, %v247_v46  ;;  %810 = vmatmul.msk.f32.gmra.mxu1 %vm375_vm1, %v794_v47 }
  0xd5   :  { %v886_v50 = vpop.eup %885  ;;  %v294_v51 = vadd.f32 1.0, %v884_v48  ;;  %v186_v52 = vpop.f32.mrf.mxu0 }
  0xd6   :  { %887 = vpow2.f32 %v271_v49  ;;  %v187_v54 = vadd.f32 %v1160_v21, %v186_v52  ;;  %v316_v55 = vmul.f32 0.6931472, %v886_v50  ;;  %v254_v49 = vsub.f32 0.0, %v238_v43  ;;  %v493_v52 = vld [vmem:[%s1347_s4 + $0x10] sm:$0xff]  ;;  %v532_v43 = vld [vmem:[%s1345_s2 + $0x40] sm:$0xff] }
  0xd7   :  { %889 = vlog2.f32 %v294_v51  ;;  %v494_v51 = vld [vmem:[%s1347_s4 + $0x18] sm:$0xff] }
  0xd8   :  { %v232_v56 = vand.u32 2147483647, %v187_v54  ;;  %v341_v57 = vadd.f32 %v316_v55, %v213_v53  ;;  %v216_v26 = vmax.f32 %v187_v54, 0.0  ;;  %513 = vmatpush.msra.mxu2 %v494_v51  ;;  %v539_v51 = vld [vmem:[%s1345_s2 + $0x78] sm:$0xff] }
  0xda   :  { %v248_v58 = vsub.f32 0.0, %v232_v56  ;;  %v795_v59 = vadd.f32 -0.6931472, %v341_v57  ;;  %514 = vmatpush.msra.mxu2 %v493_v52 }
  0xdc   :  { %v888_v60 = vpop.eup %887  ;;  %v273_v61 = vmul.f32 1.442695, %v248_v58  ;;  %811 = vmatmul.msk.f32.gmra.mxu1 %vm375_vm1, %v795_v59  ;;  %v285_v59 = vmul.f32 1.442695, %v254_v49  ;;  %v538_v49 = vld [vmem:[%s1345_s2 + $0x70] sm:$0xff] }
  0xdd   :  { %v890_v62 = vpop.eup %889  ;;  %v295_v63 = vadd.f32 1.0, %v888_v60  ;;  %v189_v0 = vpop.f32.mrf.mxu0 }
  0xde   :  { %891 = vpow2.f32 %v273_v61  ;;  %v190_v2 = vadd.f32 %v1160_v21, %v189_v0  ;;  %v318_v3 = vmul.f32 0.6931472, %v890_v62 }
  0xdf   :  { %893 = vlog2.f32 %v295_v63 }
  0xe0   :  { %v233_v4 = vand.u32 2147483647, %v190_v2  ;;  %v342_v5 = vadd.f32 %v318_v3, %v214_v1  ;;  %v217_v40 = vmax.f32 %v190_v2, 0.0  ;;  %v492_v2 = vld [vmem:[%s1347_s4 + $0x8] sm:$0xff] }
  0xe1   :  { %515 = vmatpush.msra.mxu2 %v492_v2 }
  0xe2   :  { %v249_v6 = vsub.f32 0.0, %v233_v4  ;;  %v796_v7 = vadd.f32 -0.6931472, %v342_v5 }
  0xe4   :  { %v892_v8 = vpop.eup %891  ;;  %v275_v9 = vmul.f32 1.442695, %v249_v6  ;;  %812 = vmatmul.msk.f32.gmra.mxu1 %vm375_vm1, %v796_v7 }
  0xe5   :  { %v894_v10 = vpop.eup %893  ;;  %v296_v11 = vadd.f32 1.0, %v892_v8  ;;  %v192_v12 = vpop.f32.mrf.mxu0 }
  0xe6   :  { %895 = vpow2.f32 %v275_v9  ;;  %v193_v14 = vadd.f32 %v1160_v21, %v192_v12  ;;  %v320_v15 = vmul.f32 0.6931472, %v894_v10 }
  0xe7   :  { %897 = vlog2.f32 %v296_v11 }
  0xe8   :  { %v234_v16 = vand.u32 2147483647, %v193_v14  ;;  %v343_v17 = vadd.f32 %v320_v15, %v215_v13  ;;  %v218_v56 = vmax.f32 %v193_v14, 0.0 }
  0xea   :  { %v250_v18 = vsub.f32 0.0, %v234_v16  ;;  %v797_v19 = vadd.f32 -0.6931472, %v343_v17 }
  0xec   :  { %v896_v20 = vpop.eup %895  ;;  %v277_v22 = vmul.f32 1.442695, %v250_v18  ;;  %813 = vmatmul.msk.f32.gmra.mxu1 %vm375_vm1, %v797_v19 }
  0xed   :  { %v898_v23 = vpop.eup %897  ;;  %v297_v24 = vadd.f32 1.0, %v896_v20  ;;  %v195_v25 = vpop.f32.mrf.mxu0 }
  0xee   :  { %899 = vpow2.f32 %v277_v22  ;;  %v196_v27 = vadd.f32 %v1160_v21, %v195_v25  ;;  %v322_v28 = vmul.f32 0.6931472, %v898_v23 }
  0xef   :  { %901 = vlog2.f32 %v297_v24  ;;  %v222_v24 = vmax.f32 %v1188_v36, 0.0  ;;  %v525_v36 = vld [vmem:[%s1345_s2 + $0x8] sm:$0xff] }
  0xf0   :  { %v235_v29 = vand.u32 2147483647, %v196_v27  ;;  %v344_v30 = vadd.f32 %v322_v28, %v216_v26  ;;  %v219_v5 = vmax.f32 %v196_v27, 0.0 }
  0xf2   :  { %v251_v32 = vsub.f32 0.0, %v235_v29  ;;  %v798_v33 = vadd.f32 -0.6931472, %v344_v30  ;;  %v489_v29 = vld [vmem:[#allocation2] sm:$0xff]  ;;  %v490_v30 = vld [vmem:[#allocation2 + $0x8] sm:$0xff] }
  0xf4   :  { %v900_v34 = vpop.eup %899  ;;  %v279_v35 = vmul.f32 1.442695, %v251_v32  ;;  %814 = vmatmul.msk.f32.gmra.mxu1 %vm375_vm1, %v798_v33 }
  0xf5   :  { %v902_v37 = vpop.eup %901  ;;  %v298_v38 = vadd.f32 1.0, %v900_v34  ;;  %v198_v39 = vpop.f32.mrf.mxu0 }
  0xf6   :  { %903 = vpow2.f32 %v279_v35  ;;  %v199_v41 = vadd.f32 %v1160_v21, %v198_v39  ;;  %v324_v42 = vmul.f32 0.6931472, %v902_v37  ;;  %v524_v35 = vld [vmem:[%s1345_s2] sm:$0xff]  ;;  %v526_v37 = vld [vmem:[%s1345_s2 + $0x10] sm:$0xff] }
  0xf7   :  { %905 = vlog2.f32 %v298_v38  ;;  %v527_v38 = vld [vmem:[%s1345_s2 + $0x18] sm:$0xff]  ;;  %v528_v39 = vld [vmem:[%s1345_s2 + $0x20] sm:$0xff] }
  0xf8   :  { %v236_v44 = vand.u32 2147483647, %v199_v41  ;;  %v345_v45 = vadd.f32 %v324_v42, %v217_v40  ;;  %v220_v14 = vmax.f32 %v199_v41, 0.0  ;;  %v529_v40 = vld [vmem:[%s1345_s2 + $0x28] sm:$0xff]  ;;  %v530_v41 = vld [vmem:[%s1345_s2 + $0x30] sm:$0xff]  ;;  %v531_v42 = vld [vmem:[%s1345_s2 + $0x38] sm:$0xff] }
  0xfa   :  { %v252_v46 = vsub.f32 0.0, %v236_v44  ;;  %v799_v47 = vadd.f32 -0.6931472, %v345_v45  ;;  %v533_v44 = vld [vmem:[%s1345_s2 + $0x48] sm:$0xff]  ;;  %v534_v45 = vld [vmem:[%s1345_s2 + $0x50] sm:$0xff] }
  0xfc   :  { %v904_v48 = vpop.eup %903  ;;  %v281_v50 = vmul.f32 1.442695, %v252_v46  ;;  %815 = vmatmul.msk.f32.gmra.mxu1 %vm375_vm1, %v799_v47  ;;  %v535_v46 = vld [vmem:[%s1345_s2 + $0x58] sm:$0xff]  ;;  %v536_v47 = vld [vmem:[%s1345_s2 + $0x60] sm:$0xff] }
  0xfd   :  { %v906_v53 = vpop.eup %905  ;;  %v299_v54 = vadd.f32 1.0, %v904_v48  ;;  %v201_v55 = vpop.f32.mrf.mxu0  ;;  %v537_v48 = vld [vmem:[%s1345_s2 + $0x68] sm:$0xff] }
  0xfe   :  { %907 = vpow2.f32 %v281_v50  ;;  %v202_v57 = vadd.f32 %v1160_v21, %v201_v55  ;;  %v326_v58 = vmul.f32 0.6931472, %v906_v53  ;;  %v491_v21 = vld [vmem:[%s1347_s4] sm:$0xff] }
  0xff   :  { %909 = vlog2.f32 %v299_v54  ;;  %516 = vmatpush.msra.mxu2 %v491_v21  ;;  %v1286_v53 = vld [vmem:[%s1351_s8] ss:$0 sm:$0xff] }
 0x100   :  { %v237_v60 = vand.u32 2147483647, %v202_v57  ;;  %v346_v61 = vadd.f32 %v326_v58, %v218_v56  ;;  %911 = vpow2.f32 %v285_v59  ;;  %v221_v19 = vmax.f32 %v202_v57, 0.0 }
 0x102   :  { %v253_v62 = vsub.f32 0.0, %v237_v60  ;;  %v800_v63 = vadd.f32 -0.6931472, %v346_v61 }
 0x104   :  { %v908_v0 = vpop.eup %907  ;;  %v283_v1 = vmul.f32 1.442695, %v253_v62  ;;  %816 = vmatmul.msk.f32.gmra.mxu1 %vm375_vm1, %v800_v63 }
 0x105   :  { %v910_v3 = vpop.eup %909  ;;  %v300_v4 = vadd.f32 1.0, %v908_v0 }
 0x106   :  { %913 = vpow2.f32 %v283_v1  ;;  %v328_v6 = vmul.f32 0.6931472, %v910_v3  ;;  %v912_v8 = vpop.eup %911 }
 0x107   :  { %915 = vlog2.f32 %v300_v4  ;;  %v302_v12 = vadd.f32 1.0, %v912_v8 }
 0x108   :  { %v347_v7 = vadd.f32 %v328_v6, %v219_v5 }
 0x10a   :  { %v801_v9 = vadd.f32 -0.6931472, %v347_v7 }
 0x10c   :  { %v914_v10 = vpop.eup %913  ;;  %817 = vmatmul.msk.f32.gmra.mxu1 %vm375_vm1, %v801_v9 }
 0x10d   :  { %v916_v11 = vpop.eup %915  ;;  %v301_v13 = vadd.f32 1.0, %v914_v10 }
 0x10e   :  { %v330_v15 = vmul.f32 0.6931472, %v916_v11 }
 0x10f   :  { %917 = vlog2.f32 %v301_v13 }
 0x110   :  { %v348_v16 = vadd.f32 %v330_v15, %v220_v14  ;;  %919 = vlog2.f32 %v302_v12 }
 0x112   :  { %v802_v17 = vadd.f32 -0.6931472, %v348_v16 }
 0x114   :  { %818 = vmatmul.msk.f32.gmra.mxu1 %vm375_vm1, %v802_v17 }
 0x115   :  { %v918_v18 = vpop.eup %917 }
 0x116   :  { %v332_v20 = vmul.f32 0.6931472, %v918_v18  ;;  %v920_v22 = vpop.eup %919 }
 0x117   :  { %v334_v26 = vmul.f32 0.6931472, %v920_v22 }
 0x118   :  { %v349_v23 = vadd.f32 %v332_v20, %v221_v19 }
 0x119   :  { %v350_v27 = vadd.f32 %v334_v26, %v222_v24 }
 0x11a   :  { %v803_v25 = vadd.f32 -0.6931472, %v349_v23 }
 0x11b   :  { %v804_v28 = vadd.f32 -0.6931472, %v350_v27 }
 0x11c   :  { %819 = vmatmul.msk.f32.vlgmr.msrb.gmra.mxu2 %vm375_vm1, %v803_v25 }
 0x124   :  { %820 = vmatmul.msk.f32.gmra.mxu2 %vm375_vm1, %v804_v28 }
 0x129   :  { %v441_v50 = vpop.f32.mrf.mxu1 }
 0x12a   :  { %v442_v54 = vadd.f32 %v1286_v53, %v441_v50  ;;  %v669_v50 = vld [vmem:[%s1346_s3] sm:$0xff] }
 0x12c   :  { %821 = vmatmul.msk.f32.vlgmr.msra.gmra.mxu2 %vm375_vm1, %v489_v29 }
 0x131   :  { %v444_v52 = vpop.f32.mrf.mxu1 }
 0x132   :  { %v445_v58 = vadd.f32 %v1286_v53, %v444_v52  ;;  %v696_v52 = vld [vmem:[%s1352_s9 + $0x10] sm:$0xff] }
 0x134   :  { %822 = vmatmul.msk.f32.gmra.mxu2 %vm375_vm1, %v490_v30 }
 0x139   :  { %v447_v57 = vpop.f32.mrf.mxu1 }
 0x13a   :  { %v448_v62 = vadd.f32 %v1286_v53, %v447_v57 }
 0x141   :  { %v450_v61 = vpop.f32.mrf.mxu1 }
 0x142   :  { %v451_v1 = vadd.f32 %v1286_v53, %v450_v61 }
 0x149   :  { %v453_v2 = vpop.f32.mrf.mxu1 }
 0x14a   :  { %v454_v4 = vadd.f32 %v1286_v53, %v453_v2 }
 0x151   :  { %v456_v7 = vpop.f32.mrf.mxu1 }
 0x152   :  { %v457_v8 = vadd.f32 %v1286_v53, %v456_v7 }
 0x159   :  { %v459_v11 = vpop.f32.mrf.mxu1 }
 0x15a   :  { %v460_v12 = vadd.f32 %v1286_v53, %v459_v11 }
 0x161   :  { %v462_v16 = vpop.f32.mrf.mxu1 }
 0x169   :  { %v465_v18 = vpop.f32.mrf.mxu1 }
 0x171   :  { %v468_v20 = vpop.f32.mrf.mxu1 }
 0x179   :  { %v471_v24 = vpop.f32.mrf.mxu1 }
 0x181   :  { %v474_v26 = vpop.f32.mrf.mxu1 }
 0x189   :  { %v477_v28 = vpop.f32.mrf.mxu1 }
 0x19f   :  { %v1215_v31 = vpop.f32.mrf.mxu2 }
 0x1a7   :  { %v1217_v32 = vpop.f32.mrf.mxu2 }
 0x1a8   :  { %v487_v30 = vadd.f32 %v1286_v53, %v1217_v32  ;;  %v472_v32 = vadd.f32 %v1286_v53, %v471_v24 }
 0x1af   :  { %v518_v33 = vpop.f32.mrf.mxu2 }
 0x1b7   :  { %v521_v34 = vpop.f32.mrf.mxu2 }
 0x1b8   :  { %602 = vmatpush.msra.mxu3 %v521_v34 }
 0x1ba   :  { %603 = vmatpush.msra.mxu3 %v518_v33  ;;  %v480_v33 = vpop.f32.mrf.mxu1 }
 0x1bb   :  { %823 = vmatmul.msk.f32.vlgmr.msra.gmra.mxu3 %vm93_vm0, %v524_v35  ;;  %v484_v35 = vadd.f32 %v1286_v53, %v1215_v31 }
 0x1c3   :  { %824 = vmatmul.msk.f32.gmra.mxu3 %vm93_vm0, %v525_v36 }
 0x1cb   :  { %825 = vmatmul.msk.f32.gmra.mxu3 %vm93_vm0, %v526_v37  ;;  %v481_v37 = vadd.f32 %v1286_v53, %v480_v33 }
 0x1d3   :  { %826 = vmatmul.msk.f32.gmra.mxu3 %vm93_vm0, %v527_v38 }
 0x1db   :  { %827 = vmatmul.msk.f32.gmra.mxu3 %vm93_vm0, %v528_v39  ;;  %v478_v39 = vadd.f32 %v1286_v53, %v477_v28 }
 0x1e3   :  { %828 = vmatmul.msk.f32.gmra.mxu3 %vm93_vm0, %v529_v40 }
 0x1eb   :  { %829 = vmatmul.msk.f32.gmra.mxu3 %vm93_vm0, %v530_v41  ;;  %v475_v41 = vadd.f32 %v1286_v53, %v474_v26 }
 0x1f3   :  { %830 = vmatmul.msk.f32.gmra.mxu3 %vm93_vm0, %v531_v42 }
 0x1fb   :  { %831 = vmatmul.msk.f32.gmra.mxu3 %vm93_vm0, %v532_v43 }
 0x203   :  { %832 = vmatmul.msk.f32.gmra.mxu3 %vm93_vm0, %v533_v44  ;;  %v469_v44 = vadd.f32 %v1286_v53, %v468_v20 }
 0x20b   :  { %833 = vmatmul.msk.f32.gmra.mxu3 %vm93_vm0, %v534_v45  ;;  %v466_v45 = vadd.f32 %v1286_v53, %v465_v18 }
 0x213   :  { %834 = vmatmul.msk.f32.gmra.mxu3 %vm93_vm0, %v535_v46 }
 0x21b   :  { %835 = vmatmul.msk.f32.gmra.mxu3 %vm93_vm0, %v536_v47  ;;  %v463_v47 = vadd.f32 %v1286_v53, %v462_v16  ;;  %v695_v53 = vld [vmem:[%s1352_s9 + $0x8] sm:$0xff] }
 0x223   :  { %836 = vmatmul.msk.f32.gmra.mxu3 %vm93_vm0, %v537_v48 }
 0x22b   :  { %837 = vmatmul.msk.f32.gmra.mxu3 %vm93_vm0, %v538_v49 }
 0x233   :  { %838 = vmatmul.msk.f32.gmra.mxu3 %vm93_vm0, %v539_v51  ;;  %v697_v51 = vld [vmem:[%s1352_s9 + $0x18] sm:$0xff] }
 0x23e   :  { %v605_v55 = vpop.f32.mrf.mxu3 }
 0x23f   :  { %v1289_v56 = vmul.f32 %v605_v55, %v442_v54  ;;  %v694_v54 = vld [vmem:[%s1352_s9] sm:$0xff]  ;;  %v670_v55 = vld [vmem:[%s1346_s3 + $0x8] sm:$0xff]  ;;  %s1011_s3 = smov [#allocation7]  }
 0x240   :  { %s757_s9 = sshll.u32 %s1011_s3, 4  ;;  %s758_s9 = int_to_ptr.vmem [resolvable:$true] %s757_s9 }
 0x246   :  { %v608_v59 = vpop.f32.mrf.mxu3 }
 0x247   :  { %v1292_v60 = vmul.f32 %v608_v59, %v445_v58  ;;  %v856_v58 = vld [vmem:[%s1353_s10] ss:$0 sm:$0xff] }
 0x24e   :  { %v611_v63 = vpop.f32.mrf.mxu3 }
 0x24f   :  { %v655_v0 = vmul.f32 %v611_v63, %v448_v62 }
 0x256   :  { %v614_v21 = vpop.f32.mrf.mxu3 }
 0x257   :  { %v656_v3 = vmul.f32 %v614_v21, %v451_v1 }
 0x25e   :  { %v617_v5 = vpop.f32.mrf.mxu3 }
 0x25f   :  { %v657_v6 = vmul.f32 %v617_v5, %v454_v4 }
 0x266   :  { %v620_v9 = vpop.f32.mrf.mxu3 }
 0x267   :  { %v658_v10 = vmul.f32 %v620_v9, %v457_v8 }
 0x26e   :  { %v623_v13 = vpop.f32.mrf.mxu3 }
 0x26f   :  { %v659_v14 = vmul.f32 %v623_v13, %v460_v12 }
 0x276   :  { %v626_v15 = vpop.f32.mrf.mxu3 }
 0x277   :  { %v660_v49 = vmul.f32 %v626_v15, %v463_v47 }
 0x27e   :  { %v629_v17 = vpop.f32.mrf.mxu3 }
 0x27f   :  { %v661_v48 = vmul.f32 %v629_v17, %v466_v45 }
 0x286   :  { %v632_v19 = vpop.f32.mrf.mxu3 }
 0x287   :  { %v662_v46 = vmul.f32 %v632_v19, %v469_v44 }
 0x28e   :  { %v635_v22 = vpop.f32.mrf.mxu3 }
 0x28f   :  { %v663_v31 = vmul.f32 %v635_v22, %v472_v32 }
 0x296   :  { %v638_v23 = vpop.f32.mrf.mxu3 }
 0x297   :  { %v664_v43 = vmul.f32 %v638_v23, %v475_v41 }
 0x29e   :  { %v641_v25 = vpop.f32.mrf.mxu3 }
 0x29f   :  { %v665_v42 = vmul.f32 %v641_v25, %v478_v39 }
 0x2a6   :  { %v644_v27 = vpop.f32.mrf.mxu3 }
 0x2a7   :  { %v666_v40 = vmul.f32 %v644_v27, %v481_v37 }
 0x2ae   :  { %v647_v29 = vpop.f32.mrf.mxu3 }
 0x2af   :  { %v667_v38 = vmul.f32 %v647_v29, %v484_v35 }
 0x2b6   :  { %v650_v34 = vpop.f32.mrf.mxu3 }
 0x2b7   :  { %v668_v36 = vmul.f32 %v650_v34, %v487_v30 }
 0x2b9   :  { %671 = vmatpush.msrb.mxu2 %v668_v36 }
 0x2bb   :  { %672 = vmatpush.msrb.mxu2 %v667_v38 }
 0x2bd   :  { %673 = vmatpush.msrb.mxu2 %v666_v40 }
 0x2bf   :  { %674 = vmatpush.msrb.mxu2 %v665_v42 }
 0x2c1   :  { %675 = vmatpush.msrb.mxu2 %v664_v43 }
 0x2c3   :  { %676 = vmatpush.msrb.mxu2 %v663_v31 }
 0x2c5   :  { %677 = vmatpush.msrb.mxu2 %v662_v46 }
 0x2c7   :  { %678 = vmatpush.msrb.mxu2 %v661_v48 }
 0x2c9   :  { %679 = vmatpush.msrb.mxu2 %v660_v49 }
 0x2cb   :  { %680 = vmatpush.msrb.mxu2 %v659_v14 }
 0x2cd   :  { %681 = vmatpush.msrb.mxu2 %v658_v10 }
 0x2cf   :  { %682 = vmatpush.msrb.mxu2 %v657_v6 }
 0x2d1   :  { %683 = vmatpush.msrb.mxu2 %v656_v3 }
 0x2d3   :  { %684 = vmatpush.msrb.mxu2 %v655_v0 }
 0x2d5   :  { %685 = vmatpush.msrb.mxu2 %v1292_v60 }
 0x2d7   :  { %686 = vmatpush.msrb.mxu2 %v1289_v56 }
 0x2d8   :  { %687 = vmatmul.f32.vlgmr.msrb.gmra.mxu2 %v669_v50 }
 0x2d9   :  { %720 = vmatpush.msra.mxu2 %v697_v51 }
 0x2db   :  { %721 = vmatpush.msra.mxu2 %v696_v52 }
 0x2dd   :  { %722 = vmatpush.msra.mxu2 %v695_v53 }
 0x2df   :  { %723 = vmatpush.msra.mxu2 %v694_v54 }
 0x2e0   :  { %690 = vmatmul.f32.gmra.mxu2 %v670_v55 }
 0x35b   :  { %v688_v56 = vpop.f32.mrf.mxu2 }
 0x35c   :  { %839 = vmatmul.msk.f32.vlgmr.msra.gmra.mxu2 %vm375_vm1, %v688_v56 }
 0x363   :  { %v691_v57 = vpop.f32.mrf.mxu2 }
 0x364   :  { %840 = vmatmul.msk.f32.gmra.mxu2 %vm375_vm1, %v691_v57 }
 0x3df   :  { %v725_v59 = vpop.f32.mrf.mxu2 }
 0x3e0   :  { %v726_v60 = vadd.f32 %v856_v58, %v725_v59 }
 0x3e2   :  { %v733_v61 = vand.u32 2147483647, %v726_v60  ;;  %v731_v9 = vmax.f32 %v726_v60, 0.0 }
 0x3e4   :  { %v735_v62 = vsub.f32 0.0, %v733_v61 }
 0x3e6   :  { %v737_v63 = vmul.f32 1.442695, %v735_v62 }
 0x3e7   :  { %v728_v0 = vpop.f32.mrf.mxu2 }
 0x3e8   :  { %921 = vpow2.f32 %v737_v63  ;;  %v729_v1 = vadd.f32 %v856_v58, %v728_v0 }
 0x3ea   :  { %v734_v2 = vand.u32 2147483647, %v729_v1  ;;  %v732_v14 = vmax.f32 %v729_v1, 0.0 }
 0x3ec   :  { %v736_v21 = vsub.f32 0.0, %v734_v2 }
 0x3ee   :  { %v922_v3 = vpop.eup %921  ;;  %v739_v4 = vmul.f32 1.442695, %v736_v21 }
 0x3ef   :  { %v741_v5 = vadd.f32 1.0, %v922_v3 }
 0x3f0   :  { %923 = vpow2.f32 %v739_v4 }
 0x3f1   :  { %925 = vlog2.f32 %v741_v5 }
 0x3f6   :  { %v924_v6 = vpop.eup %923 }
 0x3f7   :  { %v926_v7 = vpop.eup %925  ;;  %v742_v8 = vadd.f32 1.0, %v924_v6 }
 0x3f8   :  { %v744_v10 = vmul.f32 0.6931472, %v926_v7 }
 0x3f9   :  { %927 = vlog2.f32 %v742_v8 }
 0x3fa   :  { %v747_v11 = vadd.f32 %v744_v10, %v731_v9 }
 0x3fc   :  { %v841_v12 = vadd.f32 -0.6931472, %v747_v11 }
 0x3fe   :  { %751 = vst.msk [vmem:[#allocation7] sm:$0xff] %vm375_vm1, %v841_v12 }
 0x3ff   :  { %v928_v13 = vpop.eup %927 }
 0x400   :  { %v746_v15 = vmul.f32 0.6931472, %v928_v13 }
 0x402   :  { %v748_v16 = vadd.f32 %v746_v15, %v732_v14 }
 0x404   :  { %v842_v17 = vadd.f32 -0.6931472, %v748_v16 }
 0x406   :  { %752 = vst.msk [vmem:[#allocation7 + $0x8] sm:$0xff] %vm375_vm1, %v842_v17 }
 0x407   :  { %765 = dma.vmem_to_hbm [thread:$0]  %s758_s9, 256, %s760_s17, [#allocation4], %s1008_s25, %s1008_s25, %s1009_s26  }
 0x408   :  { %1005 = dma.done.wait [#allocation4], 256  }
 0x409   :  { %1006 = vsyncadd [#allocation4], 4294967040 }
 0x40a   :  { %770 = vsyncpa [#allocation3], 1 }
 0x40b   :  { %771 = vsyncpa [#allocation6], 1 }
 0x40c   :  { %772 = vsyncpa [#allocation4], 1 }

</bundles_post_ra>
